<compile_context>
chip_gen: v6e
topology: v6e:2x2x1
jax: 0.10.0
libtpu: 0.0.40
codegen_flags: <defaults>
</compile_context>

<pallas_src>
import jax
import jax.numpy as jnp
from jax import lax
from jax.experimental import pallas as pl
from jax.experimental.pallas import tpu as pltpu


def _self_attention_kernel(xq_ref, t_ref, v_ref, gamma_ref, o_ref):
    # xq_ref   : (1, C, TQ)   f32   query tile of x (also the residual)
    # t_ref    : (1, C+1, N)  bf16  [ M @ X ; c . x ]   (key-side projection + bias row)
    # v_ref    : (1, C+1, N)  bf16  [ Wv @ X + bv ; 1 ] (values + denominator row)
    # gamma_ref: (1, 1)       f32   SMEM scalar
    # o_ref    : (1, C, TQ)   f32
    C = o_ref.shape[1]
    tq = o_ref.shape[2]

    xq = xq_ref[0]                                                    # (C, TQ) f32

    # Augment the query operand with a ones row so the rb bias rides the MXU
    # contraction (K = C+1 is far below the MXU depth, so this row is free).
    xq_aug = jnp.concatenate(
        [xq.astype(jnp.bfloat16), jnp.ones((1, tq), jnp.bfloat16)], axis=0)  # (C+1, TQ)

    # energy[i, j] = x_i^T M x_j + c . x_j   -- contract sublane axis 0 of both
    # operands (no explicit transpose, both operands stay lane-dense).
    energy = lax.dot_general(
        xq_aug, t_ref[0],
        dimension_numbers=(((0,), (0,)), ((), ())),
        preferred_element_type=jnp.float32)                           # (TQ, N) f32

    # Row softmax numerator only (unnormalized); cast to bf16 right at the exp so a
    # single bf16 (TQ, N) slab feeds the value matmul.
    m_row = jnp.max(energy, axis=-1, keepdims=True)                   # (TQ, 1)
    p = jnp.exp(energy - m_row).astype(jnp.bfloat16)                  # (TQ, N) bf16

    # [ out ; l ] = V_aug @ p^T  (contract over keys).  Row C accumulates
    # l[i] = sum_j p[i, j] for free inside the same MXU matmul.
    out_aug = lax.dot_general(
        v_ref[0], p,
        dimension_numbers=(((1,), (1,)), ((), ())),
        preferred_element_type=jnp.float32)                           # (C+1, TQ) f32

    inv_l = pl.reciprocal(out_aug[C:C + 1, :], approx=True)           # (1, TQ)
    o_ref[0] = gamma_ref[0, 0] * (out_aug[:C, :] * inv_l) + xq


def self_attention_pallas(x_nchw, wq, bq, wk, bk, wv, bv, gamma):
    """x_nchw: (B, C, W, H) f32.  Weights in torch layout: wq/wk (C//8, C), wv (C, C)."""
    B, C, W, H = x_nchw.shape
    N = W * H

    # NCHW -> (B, C, N): pure reshape (row-major over (W, H)), no transpose.
    x_cn = x_nchw.reshape(B, C, N).astype(jnp.float32)

    wq = jnp.asarray(wq, jnp.float32)
    bq = jnp.asarray(bq, jnp.float32)
    wk = jnp.asarray(wk, jnp.float32)
    wv_f = jnp.asarray(wv, jnp.float32)
    bv_f = jnp.asarray(bv, jnp.float32)
    gamma2 = jnp.asarray(gamma, jnp.float32).reshape(1, 1)

    # ---- Key-side projections, computed once per call (tiny: contraction over C). ----
    m_qk = wq.T @ wk                                                  # (C, C)  = Wq^T Wk
    c_row = bq @ wk                                                   # (C,)    = Wk^T bq
    t_cn = jnp.einsum("oc,bcn->bon", m_qk, x_cn)                      # (B, C, N) = M @ X
    rb = jnp.einsum("c,bcn->bn", c_row, x_cn)[:, None, :]             # (B, 1, N) = c . x_j
    t_aug = jnp.concatenate([t_cn, rb], axis=1).astype(jnp.bfloat16)  # (B, C+1, N)

    v_cn = jnp.einsum("oc,bcn->bon", wv_f, x_cn) + bv_f[None, :, None]  # (B, C, N)
    ones_row = jnp.ones((B, 1, N), jnp.float32)
    v_aug = jnp.concatenate([v_cn, ones_row], axis=1).astype(jnp.bfloat16)  # (B, C+1, N)

    # ---- Query-tile size: whole row for small N (grid (B, 1)), else 128-lane tiles. ----
    if N <= 2048 or N % 128 != 0:
        tq = N
    elif N % 512 == 0:
        tq = 512
    elif N % 256 == 0:
        tq = 256
    else:
        tq = 128
    nq = N // tq

    # Explicit VMEM budget: double-buffered in/out tiles + (TQ, N) energy/p slabs,
    # with headroom; capped well below v7x's 64 MiB physical VMEM.
    est = (2 * (C * tq * 4 + 2 * (C + 1) * N * 2 + C * tq * 4)        # pipelined buffers
           + tq * N * (4 + 2)                                         # energy f32 + p bf16
           + (C + 1) * tq * 4)                                        # out_aug
    vmem_limit = int(min(max(2 * est, 32 * 1024 * 1024), 56 * 1024 * 1024))

    out_cn = pl.pallas_call(
        _self_attention_kernel,
        out_shape=jax.ShapeDtypeStruct((B, C, N), jnp.float32),
        grid_spec=pltpu.PrefetchScalarGridSpec(
            num_scalar_prefetch=0,
            grid=(B, nq),
            in_specs=[
                pl.BlockSpec((1, C, tq), lambda b, q: (b, 0, q)),         # x query tile
                pl.BlockSpec((1, C + 1, N), lambda b, q: (b, 0, 0)),      # T_aug (per batch)
                pl.BlockSpec((1, C + 1, N), lambda b, q: (b, 0, 0)),      # V_aug (per batch)
                pl.BlockSpec(memory_space=pltpu.MemorySpace.SMEM),        # gamma scalar
            ],
            out_specs=pl.BlockSpec((1, C, tq), lambda b, q: (b, 0, q)),
        ),
        compiler_params=pltpu.CompilerParams(
            dimension_semantics=("parallel", "parallel"),
            vmem_limit_bytes=vmem_limit),
    )(x_cn, t_aug, v_aug, gamma2)

    # (B, C, N) -> NCHW: pure reshape.
    return out_cn.reshape(B, C, W, H)


def self_attention_reference(x_nchw, wq, bq, wk, bk, wv, bv, gamma):
    """Pure-JAX f32 reference mirroring the torch forward literally."""
    B, C, W, H = x_nchw.shape
    N = W * H
    x_cn = x_nchw.reshape(B, C, N)
    q_cn = jnp.einsum("oc,bcn->bon", wq, x_cn) + bq[None, :, None]    # (B, Cq, N)
    k_cn = jnp.einsum("oc,bcn->bon", wk, x_cn) + bk[None, :, None]    # (B, Cq, N)
    v_cn = jnp.einsum("oc,bcn->bon", wv, x_cn) + bv[None, :, None]    # (B, C, N)
    proj_query = jnp.transpose(q_cn, (0, 2, 1))                       # (B, N, Cq)
    energy = jnp.einsum("bnc,bcm->bnm", proj_query, k_cn)             # (B, N, N)
    attention = jax.nn.softmax(energy, axis=-1)
    out = jnp.einsum("bcn,bmn->bcm", v_cn, attention)                 # (B, C, N)
    return gamma * out.reshape(B, C, W, H) + x_nchw


if __name__ == "__main__":
    B, C, W, H = 2, 32, 16, 16      # in_dim = 32  ->  C // 8 = 4 ; N = 256
    Cq = C // 8

    key = jax.random.PRNGKey(0)
    k_x, k_wq, k_bq, k_wk, k_bk, k_wv, k_bv = jax.random.split(key, 7)

    x = jax.random.normal(k_x, (B, C, W, H), dtype=jnp.float32)
    # torch conv weight layout (C_out, C_in) with the 1x1 kernel dims squeezed
    wq = 0.1 * jax.random.normal(k_wq, (Cq, C), dtype=jnp.float32)
    bq = 0.1 * jax.random.normal(k_bq, (Cq,), dtype=jnp.float32)
    wk = 0.1 * jax.random.normal(k_wk, (Cq, C), dtype=jnp.float32)
    bk = 0.1 * jax.random.normal(k_bk, (Cq,), dtype=jnp.float32)
    wv = 0.1 * jax.random.normal(k_wv, (C, C), dtype=jnp.float32)
    bv = 0.1 * jax.random.normal(k_bv, (C,), dtype=jnp.float32)

    # gamma = 0.0 matches the torch module's init (identity path, exact);
    # gamma = 0.7 exercises the attention path (bf16 matmul operands -> looser tol).
    for gamma in (0.0, 0.7):
        out = jax.block_until_ready(
            self_attention_pallas(x, wq, bq, wk, bk, wv, bv, gamma))
        ref = self_attention_reference(x, wq, bq, wk, bk, wv, bv, gamma)
        assert out.shape == (B, C, W, H)
        if not jnp.allclose(out, ref, atol=5e-2, rtol=5e-2):
            err = float(jnp.max(jnp.abs(out - ref)))
            raise AssertionError(f"mismatch vs reference at gamma={gamma}, max_err={err}")

    print("KERNEL_OK")
</pallas_src>

<mosaic_0001>
module attributes {stable_mosaic.version = 11 : i64} {
  func.func @_self_attention_kernel(%arg0: i32, %arg1: i32, %arg2: memref<1x32x256xf32, #tpu.memory_space<vmem>>, %arg3: memref<1x33x256xbf16, #tpu.memory_space<vmem>>, %arg4: memref<1x33x256xbf16, #tpu.memory_space<vmem>>, %arg5: memref<1x1xf32, #tpu.memory_space<smem>>, %arg6: memref<1x32x256xf32, #tpu.memory_space<vmem>>) attributes {dimension_semantics = [#tpu.dimension_semantics<parallel>, #tpu.dimension_semantics<parallel>], iteration_bounds = array<i64: 2, 1>, scalar_prefetch = 0 : i64, scratch_operands = 0 : i64, tpu.core_type = #tpu.core_type<tc>, window_params = [{transform_indices = @transform_0, window_bounds = array<i64: 1, 32, 256>}, {transform_indices = @transform_1, window_bounds = array<i64: 1, 33, 256>}, {transform_indices = @transform_2, window_bounds = array<i64: 1, 33, 256>}, {transform_indices = @transform_3, window_bounds = array<i64: 1, 1>}, {transform_indices = @transform_4, window_bounds = array<i64: 1, 32, 256>}]} {
    %c0 = arith.constant 0 : index
    %c0_0 = arith.constant 0 : index
    %c0_1 = arith.constant 0 : index
    %0 = vector.load %arg2[%c0, %c0_0, %c0_1] : memref<1x32x256xf32, #tpu.memory_space<vmem>>, vector<1x32x256xf32>
    %1 = vector.shape_cast %0 : vector<1x32x256xf32> to vector<32x256xf32>
    %2 = arith.truncf %1 : vector<32x256xf32> to vector<32x256xbf16>
    %cst = arith.constant 1.000000e+00 : bf16
    %3 = vector.broadcast %cst : bf16 to vector<1x256xbf16>
    %4 = tpu.concatenate %2, %3 in 0 : vector<32x256xbf16>, vector<1x256xbf16> -> vector<33x256xbf16>
    %c0_2 = arith.constant 0 : index
    %c0_3 = arith.constant 0 : index
    %c0_4 = arith.constant 0 : index
    %5 = vector.load %arg3[%c0_2, %c0_3, %c0_4] : memref<1x33x256xbf16, #tpu.memory_space<vmem>>, vector<1x33x256xbf16>
    %6 = vector.shape_cast %5 : vector<1x33x256xbf16> to vector<33x256xbf16>
    %cst_5 = arith.constant dense<0.000000e+00> : vector<256x256xf32>
    %7 = tpu.matmul %4, %6, %cst_5 {dimension_numbers = #tpu.dot_dimension_numbers<[0], [0], [1], [1], [0, 1, 1, 1], [], []>} : vector<33x256xbf16>, vector<33x256xbf16>, vector<256x256xf32> -> vector<256x256xf32>
    %cst_6 = arith.constant dense<0xFF800000> : vector<256xf32>
    %8 = vector.multi_reduction <maximumf>, %7, %cst_6 [1] : vector<256x256xf32> to vector<256xf32>
    %9 = vector.shape_cast %8 : vector<256xf32> to vector<256x1xf32>
    %10 = vector.broadcast %9 : vector<256x1xf32> to vector<256x256xf32>
    %11 = arith.subf %7, %10 : vector<256x256xf32>
    %12 = math.exp %11 : vector<256x256xf32>
    %13 = arith.truncf %12 : vector<256x256xf32> to vector<256x256xbf16>
    %c0_7 = arith.constant 0 : index
    %c0_8 = arith.constant 0 : index
    %c0_9 = arith.constant 0 : index
    %14 = vector.load %arg4[%c0_7, %c0_8, %c0_9] : memref<1x33x256xbf16, #tpu.memory_space<vmem>>, vector<1x33x256xbf16>
    %15 = vector.shape_cast %14 : vector<1x33x256xbf16> to vector<33x256xbf16>
    %cst_10 = arith.constant dense<0.000000e+00> : vector<33x256xf32>
    %16 = tpu.matmul %15, %13, %cst_10 {dimension_numbers = #tpu.dot_dimension_numbers<[1], [1], [0], [0], [0, 0, 1, 0], [], []>} : vector<33x256xbf16>, vector<256x256xbf16>, vector<33x256xf32> -> vector<33x256xf32>
    %17 = vector.extract_strided_slice %16 {offsets = [32, 0], sizes = [1, 256], strides = [1, 1]} : vector<33x256xf32> to vector<1x256xf32>
    %18 = tpu.reciprocal %17 {approx = true} : vector<1x256xf32> -> vector<1x256xf32>
    %c0_11 = arith.constant 0 : index
    %c0_12 = arith.constant 0 : index
    %19 = memref.load %arg5[%c0_11, %c0_12] : memref<1x1xf32, #tpu.memory_space<smem>>
    %20 = vector.extract_strided_slice %16 {offsets = [0, 0], sizes = [32, 256], strides = [1, 1]} : vector<33x256xf32> to vector<32x256xf32>
    %21 = vector.broadcast %18 : vector<1x256xf32> to vector<32x256xf32>
    %22 = arith.mulf %20, %21 : vector<32x256xf32>
    %23 = vector.broadcast %19 : f32 to vector<32x256xf32>
    %24 = arith.mulf %23, %22 : vector<32x256xf32>
    %25 = arith.addf %24, %1 : vector<32x256xf32>
    %c0_13 = arith.constant 0 : index
    %c0_14 = arith.constant 0 : index
    %c0_15 = arith.constant 0 : index
    %26 = vector.load %arg6[%c0_13, %c0_14, %c0_15] : memref<1x32x256xf32, #tpu.memory_space<vmem>>, vector<1x32x256xf32>
    %27 = vector.shape_cast %26 : vector<1x32x256xf32> to vector<32x256xf32>
    %28 = vector.shape_cast %25 : vector<32x256xf32> to vector<1x32x256xf32>
    tpu.vector_store %arg6[%c0_13, %c0_14, %c0_15], %28 {strides = array<i32>} : memref<1x32x256xf32, #tpu.memory_space<vmem>>, vector<1x32x256xf32>,
    return
  }
  func.func @transform_0(%arg0: i32, %arg1: i32) -> (i32, i32, i32) {
    %c0_i32 = arith.constant 0 : i32
    %c0_i32_0 = arith.constant 0 : i32
    return %arg0, %c0_i32, %arg1 : i32, i32, i32
  }
  func.func @transform_1(%arg0: i32, %arg1: i32) -> (i32, i32, i32) {
    %c0_i32 = arith.constant 0 : i32
    %c0_i32_0 = arith.constant 0 : i32
    %c0_i32_1 = arith.constant 0 : i32
    return %arg0, %c0_i32, %c0_i32_0 : i32, i32, i32
  }
  func.func @transform_2(%arg0: i32, %arg1: i32) -> (i32, i32, i32) {
    %c0_i32 = arith.constant 0 : i32
    %c0_i32_0 = arith.constant 0 : i32
    %c0_i32_1 = arith.constant 0 : i32
    return %arg0, %c0_i32, %c0_i32_0 : i32, i32, i32
  }
  func.func @transform_3(%arg0: i32, %arg1: i32) -> (i32, i32) {
    %c0_i32 = arith.constant 0 : i32
    %c0_i32_0 = arith.constant 0 : i32
    %c0_i32_1 = arith.constant 0 : i32
    return %c0_i32, %c0_i32_0 : i32, i32
  }
  func.func @transform_4(%arg0: i32, %arg1: i32) -> (i32, i32, i32) {
    %c0_i32 = arith.constant 0 : i32
    %c0_i32_0 = arith.constant 0 : i32
    return %arg0, %c0_i32, %arg1 : i32, i32, i32
  }
}

</mosaic_0001>

<bundles_post_ra>
// kernel: tpu_custom_call.1
= control target key start
LH: loop header
LB: loop body
LE: loop exit
PB: predicated region body
PF: predicated region fallthrough
CT: control target
= control target key end

     0   :  { %s2000_s0 = inlined_call_operand.vmem [shape: f32[2,32,256], index: 0, kind: input, shape index: {}]   ;;  %s2001_s1 = inlined_call_operand.vmem [shape: bf16[2,33,256], index: 1, kind: input, shape index: {}]   ;;  %s2002_s2 = inlined_call_operand.vmem [shape: bf16[2,33,256], index: 2, kind: input, shape index: {}]   ;;  %s2003_s3 = inlined_call_operand.<no memory space> [shape: f32[1,1], index: 3, kind: input, shape index: {}]   ;;  %s2004_s4 = inlined_call_operand.hbm [shape: f32[2,32,256], index: 4, kind: output, shape index: {}]  }
   0x1   :  { %9 = sst [smem:[#allocation2]] %s2003_s3 }
   0x2   :  { %10 = vsyncpa [#allocation4], 0 }
   0x3   :  { %12 = vsyncpa [#allocation4 + $0x1], 0  ;;  %s1543_s17 = smov 0   ;;  %s1545_s18 = smov 0  }
   0x4   :  { %s1547_s19 = smov 0   ;;  %s1549_s20 = smov 0  }
   0x5   :  { %s1551_s21 = smov 0   ;;  %s1553_s22 = smov 0  }
   0x6 LB: > { %s1171_s3 = sadd.s32 4294967295, %s1508_s22   ;;  %s1172_s23 = sadd.s32 4294967294, %s1508_s22   ;;  %s1508_s22 = sphi %s1553_s22, %s18_s22   ;;  %s1504_s21 = sphi %s1551_s21, %s2053_s21   ;;  %s1500_s20 = sphi %s1549_s20, %s2052_s20   ;;  %s1496_s19 = sphi %s1547_s19, %s2051_s19   ;;  %s1492_s18 = sphi %s1545_s18, %s2050_s18   ;;  %s1488_s17 = sphi %s1543_s17, %s2049_s17  }
   0x7   : > { %s30_s24 = sadd.s32 1, %s1504_s21  ;;  %s140_s25 = sadd.s32 1, %s1496_s19 }
   0x8   : > { %p32_p0 = scmp.ge.s32.totalorder %s30_s24, 2  ;;  %p150_p1 = scmp.ne.s32.totalorder %s1496_s19, %s1492_s18 }
   0x9   : > { %p151_p2 = scmp.eq.s32.totalorder %s1171_s3, 1  ;;  %p156_p3 = scmp.ne.s32.totalorder %s1492_s18, %s1488_s17 }
   0xa   : > { %s2055_s24 = smov (%p32_p0, %s30_s24), 0  ;;  %p157_p5 = scmp.eq.s32.totalorder %s1172_s23, 1 }
   0xb   : > { %p1583_p4 = por %p151_p2, %p150_p1  ;;  %s135_s27 = ssub.s32 %s1504_s21, %s2055_s24 }
   0xc   : > { %p1175_p6 = scmp.ge.s32.totalorder %s1508_s22, 1  ;;  %p138_p7 = scmp.eq.s32.totalorder %s135_s27, 0 }
   0xd   : > { %p1590_p8 = por %p157_p5, %p156_p3  ;;  %p207_p9 = scmp.lt.s32.totalorder %s1508_s22, 3 }
   0xe   : > { %s1596_s29 = scalar_select %p138_p7, %s1496_s19, %s140_s25  }
   0xf   : > { %p208_p10 = pnand %p1175_p6, %p207_p9 }
  0x11   : > { %211 = sbr.rel (%p208_p10) target bundleno = 923 (0x39b), region = 36 }
  0x16   : > { %p248_p11 = scmp.lt.s32.totalorder %s1500_s20, 1  ;;  %v1510_v0 = vmov 0   ;;  %vm393_vm0 = vcmask 1040384   ;;  %v1511_v22 = vmov 1065369472   ;;  %vm344_vm1 = vcmask 269312  }
  0x17   : > { %434 = vmatprep.mubr.bf16.mxu0 %v1510_v0  ;;  %v395_v12 = vsel %vm393_vm0, 65535, %v1510_v0  ;;  %s1010_s16 = sld [smem:[#allocation2]]  ;;  %s244_s3 = sand.u32 1, %s1492_s18  }
  0x18   : > { %s1601_s30 = scalar_select %p248_p11, %s1500_s20, 1 }
  0x19   : > { %s1176_s23 = sshll.u32 %s244_s3, 6  ;;  %s1215_s25 = sshll.u32 %s1500_s20, 10 }
  0x1a   : > { %s1214_s5 = sshll.u32 %s1601_s30, 6  ;;  %s1216_s6 = smul.u32 40, %s1601_s30 }
  0x1b   : > { %s1608_s9 = scalar_lea.vmem %s2000_s0, %s1214_s5  ;;  %s1927_s27 = scalar_lea.vmem [#allocation3], %s1176_s23 }
  0x1c   : > { %v270_v1 = vld [vmem:[%s1608_s9] sm:$0xff]  ;;  %v272_v2 = vld [vmem:[%s1608_s9 + $0x10] sm:$0xff]  ;;  %s261_s12 = scalar_lea.vmem %s2001_s1, %s1216_s6  ;;  %v271_v6 = vld [vmem:[%s1608_s9 + $0x8] sm:$0xff]  ;;  %s1865_s15 = scalar_lea.vmem %s2002_s2, %s1216_s6 }
  0x1d   : > { %v274_v3 = vld [vmem:[%s1608_s9 + $0x20] sm:$0xff]  ;;  %v278_v4 = vpack.c.bf16 %v272_v2, %v270_v1  ;;  %v276_v5 = vld [vmem:[%s1608_s9 + $0x30] sm:$0xff]  ;;  %v273_v7 = vld [vmem:[%s1608_s9 + $0x18] sm:$0xff]  ;;  %s1068_s30 = sshll.u32 %s1927_s27, 4  ;;  %s1941_s6 = scalar_lea.hbm %s2004_s4, %s1215_s25  ;;  %s1943_s30 = int_to_ptr.vmem [resolvable:$true] %s1068_s30 }
  0x1e   : > { %v279_v8 = vpack.c.bf16 %v273_v7, %v271_v6  ;;  %v275_v9 = vld [vmem:[%s1608_s9 + $0x28] sm:$0xff]  ;;  %v277_v10 = vld [vmem:[%s1608_s9 + $0x38] sm:$0xff]  ;;  %v286_v11 = vld [vmem:[%s261_s12 + $0x20] sm:$0x11]  ;;  %v280_v13 = vpack.c.bf16 %v276_v5, %v274_v3  ;;  %s1955_s7 = scalar_lea.sflag [#allocation4], %s244_s3  ;;  %s1432_s8 = scalar_lea.vmem %s1943_s30, 1024 }
  0x1f   : > { %287 = vxpose.xlu0.c.b16.start [1/3] (short) %v278_v4, 128  ;;  %v1186_v14 = vcombine.high %v286_v11, %v286_v11  ;;  %v1185_v15 = vcombine.low %v286_v11, %v286_v11  ;;  %v281_v16 = vpack.c.bf16 %v277_v10, %v275_v9  ;;  %v1278_v19 = vld [vmem:[%s261_s12 + $0x14] ss:$8 sps:$4 sm:$0xff]   ;;  %v1280_v20 = vld [vmem:[%s261_s12 + $0x10] ss:$8 sps:$4 sm:$0xff]   ;;  %v1281_v21 = vld [vmem:[%s261_s12 + $0x4] ss:$8 sps:$4 sm:$0xff]   ;;  %p1433_p12 = scmp.ne.s32.totalorder %s1943_s30, %s1432_s8 }
  0x20   : > { %303 = vxpose.xlu1.c.b16.start [1/3] (short) %v279_v8, 128  ;;  %v1283_v23 = vld [vmem:[%s261_s12] ss:$8 sps:$4 sm:$0xff]   ;;  %s1512_s10 = smov [#allocation3]  }
  0x21   : > { %v400_v17 = vand.u32 %v1186_v14, %v395_v12  ;;  %v397_v18 = vand.u32 %v1185_v15, %v395_v12  ;;  %p1434_p13 = pnand %p1433_p12, %p1583_p4  ;;  %s1436_s11 = sshll.u32 %s1512_s10, 4  ;;  %s1437_s11 = int_to_ptr.vmem [resolvable:$false] %s1436_s11 }
  0x22   : > { %s1438_s12 = scalar_lea.vmem %s1437_s11, 2048  ;;  %p1439_p1 = scmp.lt.s32.totalorder %s1943_s30, %s1437_s11 }
  0x23   : > { %288 = vxpose.xlu0.c.b16.cont [2/3] (short) %v280_v13, 128  ;;  %412 = vmatprep.subr.bf16.mxu0 %v400_v17  ;;  %p1435_p0 = pneg %p1434_p13  ;;  %p1440_p2 = scmp.lt.s32.totalorder %s1438_s12, %s1432_s8 }
  0x24   : > { %304 = vxpose.xlu1.c.b16.cont [2/3] (short) %v281_v16, 128  ;;  %413 = vmatpush1.bf16.msra.mxu0 %v397_v18 }
  0x25   : > { %414 = vmatprep.subr.bf16.mxu0 %v1278_v19  ;;  %p1441_p3 = por %p1440_p2, %p1439_p1 }
  0x27   : > { %289 = vxpose.xlu0.c.b16.end [3/3] (short) %v1511_v22, 128  ;;  %p1442_p5 = pnand %p1441_p3, %p1435_p0 }
  0x28   : > { %305 = vxpose.xlu1.c.b16.end [3/3] (short) %v1511_v22, 128  ;;  %415 = vmatpush1.bf16.msra.mxu0 %v1280_v20 }
  0x29   : > { %416 = vmatprep.subr.bf16.mxu0 %v1281_v21 }
  0x2c   : > { %417 = vmatpush1.bf16.msra.mxu0 %v1283_v23 }
  0x81   : > { %v295_v24 = vpop.trf.xlu0 }
  0x82   : > { %1187 = vmatmul.mubr.msk.bf16.vlgmr.msra.gmra.mxu0 %vm344_vm1, %v295_v24  ;;  %v311_v32 = vpop.trf.xlu1 }
  0x83   : > { %444 = vmatprep.mubr.bf16.mxu0 %v1510_v0 }
  0x85   : > { %v296_v25 = vpop.trf.xlu0 }
  0x86   : > { %v312_v33 = vpop.trf.xlu1 }
  0x89   : > { %v297_v26 = vpop.trf.xlu0 }
  0x8a   : > { %1188 = vmatmul.mubr.msk.bf16.gmra.mxu0 %vm344_vm1, %v296_v25  ;;  %v313_v34 = vpop.trf.xlu1 }
  0x8b   : > { %454 = vmatprep.mubr.bf16.mxu0 %v1510_v0 }
  0x8d   : > { %v298_v27 = vpop.trf.xlu0 }
  0x8e   : > { %v314_v35 = vpop.trf.xlu1 }
  0x91   : > { %v299_v28 = vpop.trf.xlu0 }
  0x92   : > { %1189 = vmatmul.mubr.msk.bf16.gmra.mxu0 %vm344_vm1, %v297_v26  ;;  %v315_v36 = vpop.trf.xlu1 }
  0x93   : > { %464 = vmatprep.mubr.bf16.mxu0 %v1510_v0 }
  0x95   : > { %v300_v29 = vpop.trf.xlu0 }
  0x96   : > { %v316_v37 = vpop.trf.xlu1 }
  0x99   : > { %v301_v30 = vpop.trf.xlu0 }
  0x9a   : > { %1190 = vmatmul.mubr.msk.bf16.gmra.mxu0 %vm344_vm1, %v298_v27  ;;  %v317_v38 = vpop.trf.xlu1 }
  0x9b   : > { %474 = vmatprep.mubr.bf16.mxu0 %v1510_v0 }
  0x9d   : > { %v302_v31 = vpop.trf.xlu0 }
  0x9e   : > { %v318_v39 = vpop.trf.xlu1 }
  0xa2   : > { %1191 = vmatmul.mubr.msk.bf16.gmra.mxu0 %vm344_vm1, %v299_v28 }
  0xa3   : > { %484 = vmatprep.mubr.bf16.mxu0 %v1510_v0 }
  0xaa   : > { %1192 = vmatmul.mubr.msk.bf16.gmra.mxu0 %vm344_vm1, %v300_v29 }
  0xab   : > { %494 = vmatprep.mubr.bf16.mxu0 %v1510_v0 }
  0xb2   : > { %1193 = vmatmul.mubr.msk.bf16.gmra.mxu0 %vm344_vm1, %v301_v30 }
  0xb3   : > { %504 = vmatprep.mubr.bf16.mxu0 %v1510_v0 }
  0xba   : > { %1194 = vmatmul.mubr.msk.bf16.gmra.mxu0 %vm344_vm1, %v302_v31 }
  0xbb   : > { %514 = vmatprep.mubr.bf16.mxu0 %v1510_v0 }
  0xc2   : > { %1195 = vmatmul.mubr.msk.bf16.gmra.mxu0 %vm344_vm1, %v311_v32 }
  0xc3   : > { %524 = vmatprep.mubr.bf16.mxu0 %v1510_v0 }
  0xca   : > { %1196 = vmatmul.mubr.msk.bf16.gmra.mxu0 %vm344_vm1, %v312_v33 }
  0xcb   : > { %534 = vmatprep.mubr.bf16.mxu0 %v1510_v0 }
  0xd2   : > { %1197 = vmatmul.mubr.msk.bf16.gmra.mxu0 %vm344_vm1, %v313_v34 }
  0xd3   : > { %544 = vmatprep.mubr.bf16.mxu0 %v1510_v0 }
  0xda   : > { %1198 = vmatmul.mubr.msk.bf16.gmra.mxu0 %vm344_vm1, %v314_v35 }
  0xdb   : > { %554 = vmatprep.mubr.bf16.mxu0 %v1510_v0 }
  0xe2   : > { %1199 = vmatmul.mubr.msk.bf16.gmra.mxu0 %vm344_vm1, %v315_v36 }
  0xe3   : > { %564 = vmatprep.mubr.bf16.mxu0 %v1510_v0 }
  0xea   : > { %1200 = vmatmul.mubr.msk.bf16.gmra.mxu0 %vm344_vm1, %v316_v37 }
  0xeb   : > { %574 = vmatprep.mubr.bf16.mxu0 %v1510_v0 }
  0xf2   : > { %1201 = vmatmul.mubr.msk.bf16.gmra.mxu0 %vm344_vm1, %v317_v38 }
  0xf3   : > { %584 = vmatprep.mubr.bf16.mxu0 %v1510_v0 }
  0xfa   : > { %1202 = vmatmul.mubr.msk.bf16.gmra.mxu0 %vm344_vm1, %v318_v39 }
 0x142   : > { %v1655_v40 = vpop.f32.mrf.mxu0 }
 0x143   : > { %2021 = vst [vmem:[#allocation6_spill] sm:$0xff] %v1655_v40 }
 0x144   : > { %v1657_v41 = vpop.f32.mrf.mxu0 }
 0x145   : > { %2022 = vst [vmem:[#allocation7_spill] sm:$0xff] %v1657_v41  ;;  %v595_v33 = vmax.f32 %v1655_v40, %v1657_v41 }
 0x146   : > { %v1659_v42 = vpop.f32.mrf.mxu0 }
 0x147   : > { %2023 = vst [vmem:[#allocation8_spill] sm:$0xff] %v1659_v42 }
 0x148   : > { %v1661_v43 = vpop.f32.mrf.mxu0 }
 0x149   : > { %2024 = vst [vmem:[#allocation9_spill] sm:$0xff] %v1661_v43  ;;  %v598_v37 = vmax.f32 %v1659_v42, %v1661_v43 }
 0x14a   : > { %v1663_v44 = vpop.f32.mrf.mxu0 }
 0x14b   : > { %2025 = vst [vmem:[#allocation10_spill] sm:$0xff] %v1663_v44 }
 0x14c   : > { %v1665_v45 = vpop.f32.mrf.mxu0 }
 0x14d   : > { %v601_v29 = vmax.f32 %v1663_v44, %v1665_v45 }
 0x14e   : > { %v1667_v46 = vpop.f32.mrf.mxu0 }
 0x150   : > { %v1669_v47 = vpop.f32.mrf.mxu0 }
 0x151   : > { %v604_v34 = vmax.f32 %v1667_v46, %v1669_v47 }
 0x152   : > { %v1671_v48 = vpop.f32.mrf.mxu0 }
 0x154   : > { %v1673_v49 = vpop.f32.mrf.mxu0 }
 0x155   : > { %v607_v25 = vmax.f32 %v1671_v48, %v1673_v49 }
 0x156   : > { %v1675_v50 = vpop.f32.mrf.mxu0 }
 0x158   : > { %v1677_v51 = vpop.f32.mrf.mxu0 }
 0x159   : > { %v610_v30 = vmax.f32 %v1675_v50, %v1677_v51 }
 0x15a   : > { %v1679_v52 = vpop.f32.mrf.mxu0 }
 0x15c   : > { %v1681_v53 = vpop.f32.mrf.mxu0 }
 0x15d   : > { %v613_v21 = vmax.f32 %v1679_v52, %v1681_v53 }
 0x15e   : > { %v1683_v54 = vpop.f32.mrf.mxu0 }
 0x160   : > { %v1685_v55 = vpop.f32.mrf.mxu0 }
 0x161   : > { %v616_v26 = vmax.f32 %v1683_v54, %v1685_v55 }
 0x162   : > { %v1687_v56 = vpop.f32.mrf.mxu0 }
 0x164   : > { %v1689_v57 = vpop.f32.mrf.mxu0 }
 0x165   : > { %v619_v17 = vmax.f32 %v1687_v56, %v1689_v57 }
 0x166   : > { %v1691_v58 = vpop.f32.mrf.mxu0 }
 0x168   : > { %v1693_v59 = vpop.f32.mrf.mxu0 }
 0x169   : > { %v622_v22 = vmax.f32 %v1691_v58, %v1693_v59 }
 0x16a   : > { %v1695_v60 = vpop.f32.mrf.mxu0 }
 0x16c   : > { %v1697_v61 = vpop.f32.mrf.mxu0 }
 0x16d   : > { %v625_v13 = vmax.f32 %v1695_v60, %v1697_v61 }
 0x16e   : > { %v1699_v62 = vpop.f32.mrf.mxu0 }
 0x170   : > { %v1701_v63 = vpop.f32.mrf.mxu0 }
 0x171   : > { %v628_v18 = vmax.f32 %v1699_v62, %v1701_v63 }
 0x172   : > { %v1703_v0 = vpop.f32.mrf.mxu0 }
 0x174   : > { %v1705_v1 = vpop.f32.mrf.mxu0 }
 0x175   : > { %v631_v9 = vmax.f32 %v1703_v0, %v1705_v1 }
 0x176   : > { %v1707_v2 = vpop.f32.mrf.mxu0 }
 0x178   : > { %v1709_v3 = vpop.f32.mrf.mxu0 }
 0x179   : > { %v634_v14 = vmax.f32 %v1707_v2, %v1709_v3 }
 0x17a   : > { %v1711_v4 = vpop.f32.mrf.mxu0 }
 0x17c   : > { %v1713_v5 = vpop.f32.mrf.mxu0 }
 0x17d   : > { %v637_v6 = vmax.f32 %v1711_v4, %v1713_v5 }
 0x17e   : > { %v1717_v7 = vpop.f32.mrf.mxu0 }
 0x17f   : > { %638 = vmax.xlane.f32.xlu0 %v637_v6 }
 0x180   : > { %v1719_v8 = vpop.f32.mrf.mxu0 }
 0x181   : > { %v640_v10 = vmax.f32 %v1717_v7, %v1719_v8 }
 0x182   : > { %v1725_v11 = vpop.f32.mrf.mxu0 }
 0x183   : > { %2026 = vst [vmem:[#allocation11_spill] sm:$0xff] %v1725_v11  ;;  %632 = vmax.xlane.f32.xlu0 %v631_v9  ;;  %641 = vmax.xlane.f32.xlu1 %v640_v10 }
 0x184   : > { %v1727_v12 = vpop.f32.mrf.mxu0 }
 0x185   : > { %2027 = vst [vmem:[#allocation12_spill] sm:$0xff] %v1727_v12 }
 0x186   : > { %v1733_v15 = vpop.f32.mrf.mxu0 }
 0x187   : > { %626 = vmax.xlane.f32.xlu0 %v625_v13  ;;  %635 = vmax.xlane.f32.xlu1 %v634_v14 }
 0x188   : > { %v1735_v16 = vpop.f32.mrf.mxu0 }
 0x18a   : > { %v1741_v19 = vpop.f32.mrf.mxu0 }
 0x18b   : > { %2028 = vst [vmem:[#allocation13_spill] sm:$0xff] %v1741_v19  ;;  %620 = vmax.xlane.f32.xlu0 %v619_v17  ;;  %629 = vmax.xlane.f32.xlu1 %v628_v18 }
 0x18c   : > { %v1743_v20 = vpop.f32.mrf.mxu0 }
 0x18d   : > { %2029 = vst [vmem:[#allocation14_spill] sm:$0xff] %v1743_v20 }
 0x18e   : > { %v1749_v23 = vpop.f32.mrf.mxu0 }
 0x18f   : > { %2030 = vst [vmem:[#allocation15_spill] sm:$0xff] %v1749_v23  ;;  %614 = vmax.xlane.f32.xlu0 %v613_v21  ;;  %623 = vmax.xlane.f32.xlu1 %v622_v22 }
 0x190   : > { %v1751_v24 = vpop.f32.mrf.mxu0 }
 0x191   : > { %2031 = vst [vmem:[#allocation16_spill] sm:$0xff] %v1751_v24 }
 0x192   : > { %v1757_v27 = vpop.f32.mrf.mxu0 }
 0x193   : > { %2032 = vst [vmem:[#allocation17_spill] sm:$0xff] %v1757_v27  ;;  %608 = vmax.xlane.f32.xlu0 %v607_v25  ;;  %617 = vmax.xlane.f32.xlu1 %v616_v26 }
 0x194   : > { %v1759_v28 = vpop.f32.mrf.mxu0 }
 0x196   : > { %v1765_v31 = vpop.f32.mrf.mxu0 }
 0x197   : > { %2033 = vst [vmem:[#allocation18_spill] sm:$0xff] %v1765_v31  ;;  %602 = vmax.xlane.f32.xlu0 %v601_v29  ;;  %611 = vmax.xlane.f32.xlu1 %v610_v30 }
 0x198   : > { %v1767_v32 = vpop.f32.mrf.mxu0 }
 0x19a   : > { %v1773_v35 = vpop.f32.mrf.mxu0 }
 0x19b   : > { %596 = vmax.xlane.f32.xlu0 %v595_v33  ;;  %605 = vmax.xlane.f32.xlu1 %v604_v34 }
 0x19c   : > { %v1775_v36 = vpop.f32.mrf.mxu0 }
 0x19e   : > { %v1779_v38 = vpop.f32.mrf.mxu0 }
 0x19f   : > { %599 = vmax.xlane.f32.xlu1 %v598_v37 }
 0x1a0   : > { %v1781_v39 = vpop.f32.mrf.mxu0 }
 0x1a2   : > { %v1783_v6 = vpop.f32.mrf.mxu0 }
 0x1a4   : > { %v1785_v9 = vpop.f32.mrf.mxu0 }
 0x1a6   : > { %v1787_v10 = vpop.f32.mrf.mxu0 }
 0x1a8   : > { %v1789_v13 = vpop.f32.mrf.mxu0 }
 0x1aa   : > { %v1791_v14 = vpop.f32.mrf.mxu0 }
 0x1ac   : > { %v1793_v17 = vpop.f32.mrf.mxu0 }
 0x1ad   : > { %v673_v44 = vmax.f32 %v1791_v14, %v1793_v17 }
 0x1ae   : > { %v1795_v18 = vpop.f32.mrf.mxu0 }
 0x1b0   : > { %v1797_v21 = vpop.f32.mrf.mxu0 }
 0x1b2   : > { %v1799_v22 = vpop.f32.mrf.mxu0 }
 0x1b4   : > { %v1801_v25 = vpop.f32.mrf.mxu0 }
 0x1b5   : > { %v679_v41 = vmax.f32 %v1799_v22, %v1801_v25 }
 0x1b6   : > { %v1803_v26 = vpop.f32.mrf.mxu0 }
 0x1b8   : > { %v1805_v29 = vpop.f32.mrf.mxu0 }
 0x1b9   : > { %v682_v43 = vmax.f32 %v1803_v26, %v1805_v29 }
 0x1ba   : > { %v1807_v30 = vpop.f32.mrf.mxu0 }
 0x1bc   : > { %v1809_v33 = vpop.f32.mrf.mxu0 }
 0x1bd   : > { %2034 = vst [vmem:[#allocation19_spill] sm:$0xff] %v1809_v33  ;;  %v685_v34 = vmax.f32 %v1807_v30, %v1809_v33  ;;  %v676_v33 = vmax.f32 %v1795_v18, %v1797_v21 }
 0x1be   : > { %v1813_v37 = vpop.f32.mrf.mxu0 }
 0x1bf   : > { %686 = vmax.xlane.f32.xlu0 %v685_v34  ;;  %v667_v34 = vmax.f32 %v1783_v6, %v1785_v9 }
 0x1c0   : > { %v1815_v40 = vpop.f32.mrf.mxu0 }
 0x1c1   : > { %v688_v42 = vmax.f32 %v1813_v37, %v1815_v40 }
 0x1c3   : > { %680 = vmax.xlane.f32.xlu0 %v679_v41  ;;  %689 = vmax.xlane.f32.xlu1 %v688_v42  ;;  %v661_v41 = vmax.f32 %v1773_v35, %v1775_v36  ;;  %v670_v42 = vmax.f32 %v1787_v10, %v1789_v13 }
 0x1c7   : > { %674 = vmax.xlane.f32.xlu0 %v673_v44  ;;  %683 = vmax.xlane.f32.xlu1 %v682_v43  ;;  %v655_v44 = vmax.f32 %v1757_v27, %v1759_v28  ;;  %v664_v43 = vmax.f32 %v1779_v38, %v1781_v39 }
 0x1cb   : > { %668 = vmax.xlane.f32.xlu0 %v667_v34  ;;  %677 = vmax.xlane.f32.xlu1 %v676_v33  ;;  %v649_v34 = vmax.f32 %v1741_v19, %v1743_v20  ;;  %v658_v33 = vmax.f32 %v1765_v31, %v1767_v32 }
 0x1cf   : > { %662 = vmax.xlane.f32.xlu0 %v661_v41  ;;  %671 = vmax.xlane.f32.xlu1 %v670_v42  ;;  %v643_v41 = vmax.f32 %v1725_v11, %v1727_v12  ;;  %v652_v42 = vmax.f32 %v1749_v23, %v1751_v24 }
 0x1d3   : > { %656 = vmax.xlane.f32.xlu0 %v655_v44  ;;  %665 = vmax.xlane.f32.xlu1 %v664_v43  ;;  %v646_v44 = vmax.f32 %v1733_v15, %v1735_v16 }
 0x1d7   : > { %650 = vmax.xlane.f32.xlu0 %v649_v34  ;;  %659 = vmax.xlane.f32.xlu1 %v658_v33 }
 0x1db   : > { %644 = vmax.xlane.f32.xlu0 %v643_v41  ;;  %653 = vmax.xlane.f32.xlu1 %v652_v42 }
 0x1df   : > { %647 = vmax.xlane.f32.xlu1 %v646_v44 }
 0x208   : > { %v639_v43 = vpop.xlane.xlu0 %638 }
 0x209   : > { %v719_v19 = vsub.f32 %v1711_v4, %v639_v43  ;;  %v720_v20 = vsub.f32 %v1713_v5, %v639_v43 }
 0x20b   : > { %v811_v33 = vmul.f32 1.442695, %v719_v19  ;;  %v813_v11 = vmul.f32 1.442695, %v720_v20 }
 0x20c   : > { %v633_v27 = vpop.xlane.xlu0 %632  ;;  %v642_v34 = vpop.xlane.xlu1 %641 }
 0x20d   : > { %v721_v31 = vsub.f32 %v1717_v7, %v642_v34  ;;  %v722_v12 = vsub.f32 %v1719_v8, %v642_v34  ;;  %v716_v41 = vsub.f32 %v1705_v1, %v633_v27  ;;  %1292 = vpow2.f32 %v811_v33 }
 0x20e   : > { %1294 = vpow2.f32 %v813_v11  ;;  %v715_v20 = vsub.f32 %v1703_v0, %v633_v27 }
 0x20f   : > { %v815_v42 = vmul.f32 1.442695, %v721_v31  ;;  %v817_v23 = vmul.f32 1.442695, %v722_v12  ;;  %v805_v4 = vmul.f32 1.442695, %v716_v41 }
 0x210   : > { %v636_v24 = vpop.xlane.xlu1 %635  ;;  %v627_v5 = vpop.xlane.xlu0 %626 }
 0x211   : > { %v718_v44 = vsub.f32 %v1709_v3, %v636_v24  ;;  %1296 = vpow2.f32 %v815_v42  ;;  %v717_v43 = vsub.f32 %v1707_v2, %v636_v24  ;;  %v712_v8 = vsub.f32 %v1697_v61, %v627_v5  ;;  %v1286_v42 = vld [vmem:[%s1865_s15 + $0x4] ss:$8 sps:$4 sm:$0xff]  }
 0x212   : > { %1298 = vpow2.f32 %v817_v23  ;;  %v803_v3 = vmul.f32 1.442695, %v715_v20  ;;  %v711_v61 = vsub.f32 %v1695_v60, %v627_v5  ;;  %979 = vmatprep.mubr.bf16.mxu1 %v1286_v42 }
 0x213   : > { %v809_v19 = vmul.f32 1.442695, %v718_v44  ;;  %1300 = vpow2.f32 %v805_v4  ;;  %v807_v12 = vmul.f32 1.442695, %v717_v43  ;;  %v797_v34 = vmul.f32 1.442695, %v712_v8 }
 0x214   : > { %v630_v7 = vpop.xlane.xlu1 %629  ;;  %v621_v33 = vpop.xlane.xlu0 %620  ;;  %v795_v44 = vmul.f32 1.442695, %v711_v61 }
 0x215   : > { %v714_v1 = vsub.f32 %v1701_v63, %v630_v7  ;;  %1302 = vpow2.f32 %v809_v19  ;;  %v713_v2 = vsub.f32 %v1699_v62, %v630_v7  ;;  %v708_v0 = vsub.f32 %v1689_v57, %v621_v33 }
 0x216   : > { %1304 = vpow2.f32 %v807_v12 }
 0x217   : > { %v801_v11 = vmul.f32 1.442695, %v714_v1  ;;  %v799_v27 = vmul.f32 1.442695, %v713_v2  ;;  %v789_v60 = vmul.f32 1.442695, %v708_v0  ;;  %v707_v1 = vsub.f32 %v1687_v56, %v621_v33 }
 0x218   : > { %v624_v31 = vpop.xlane.xlu1 %623  ;;  %v615_v19 = vpop.xlane.xlu0 %614 }
 0x219   : > { %1306 = vpow2.f32 %v801_v11  ;;  %v710_v23 = vsub.f32 %v1693_v59, %v624_v31  ;;  %v709_v7 = vsub.f32 %v1691_v58, %v624_v31  ;;  %v704_v12 = vsub.f32 %v1681_v53, %v615_v19 }
 0x21a   : > { %1308 = vpow2.f32 %v803_v3  ;;  %v1293_v63 = vpop.eup %1292  ;;  %v787_v58 = vmul.f32 1.442695, %v707_v1 }
 0x21b   : > { %1310 = vpow2.f32 %v797_v34  ;;  %v1295_v24 = vpop.eup %1294  ;;  %v793_v41 = vmul.f32 1.442695, %v710_v23  ;;  %v791_v3 = vmul.f32 1.442695, %v709_v7 }
 0x21c   : > { %v618_v4 = vpop.xlane.xlu1 %617  ;;  %1312 = vpow2.f32 %v799_v27  ;;  %v609_v0 = vpop.xlane.xlu0 %608  ;;  %v703_v27 = vsub.f32 %v1679_v52, %v615_v19 }
 0x21d   : > { %1314 = vpow2.f32 %v793_v41  ;;  %v706_v57 = vsub.f32 %v1685_v55, %v618_v4 }
 0x21e   : > { %v1297_v62 = vpop.eup %1296  ;;  %1316 = vpow2.f32 %v795_v44 }
 0x21f   : > { %v1299_v59 = vpop.eup %1298  ;;  %v897_v43 = vpack.c.bf16 %v1297_v62, %v1293_v63  ;;  %1318 = vpow2.f32 %v789_v60  ;;  %v785_v2 = vmul.f32 1.442695, %v706_v57  ;;  %v781_v63 = vmul.f32 1.442695, %v704_v12 }
 0x220   : > { %v898_v5 = vpack.c.bf16 %v1299_v59, %v1295_v24  ;;  %v1301_v20 = vpop.eup %1300  ;;  %v612_v31 = vpop.xlane.xlu1 %611  ;;  %1320 = vpow2.f32 %v791_v3  ;;  %v705_v24 = vsub.f32 %v1683_v54, %v618_v4  ;;  %v700_v62 = vsub.f32 %v1673_v49, %v609_v0 }
 0x221   : > { %1322 = vpow2.f32 %v785_v2  ;;  %v702_v33 = vsub.f32 %v1677_v51, %v612_v31  ;;  %v779_v60 = vmul.f32 1.442695, %v703_v27  ;;  %v603_v51 = vpop.xlane.xlu0 %602  ;;  %v701_v7 = vsub.f32 %v1675_v50, %v612_v31 }
 0x222   : > { %947 = vmatprep.subr.bf16.mxu1 %v898_v5  ;;  %v1303_v8 = vpop.eup %1302  ;;  %1324 = vpow2.f32 %v787_v58  ;;  %v783_v41 = vmul.f32 1.442695, %v705_v24  ;;  %v773_v4 = vmul.f32 1.442695, %v700_v62  ;;  %v699_v49 = vsub.f32 %v1671_v48, %v609_v0  ;;  %v2035_v48 = vld [vmem:[#allocation9_spill] sm:$0xff]  ;;  %v2037_v0 = vld [vmem:[#allocation7_spill] sm:$0xff] }
 0x223   : > { %948 = vmatpush1.bf16.xpose.msra.mxu1 %v897_v43  ;;  %v896_v11 = vpack.c.bf16 %v1303_v8, %v1301_v20  ;;  %v1305_v34 = vpop.eup %1304  ;;  %1326 = vpow2.f32 %v781_v63  ;;  %v777_v59 = vmul.f32 1.442695, %v702_v33  ;;  %v696_v57 = vsub.f32 %v1665_v45, %v603_v51  ;;  %v2036_v45 = vld [vmem:[#allocation10_spill] sm:$0xff] }
 0x224   : > { %v606_v5 = vpop.xlane.xlu1 %605  ;;  %1328 = vpow2.f32 %v783_v41  ;;  %v775_v8 = vmul.f32 1.442695, %v701_v7  ;;  %v771_v3 = vmul.f32 1.442695, %v699_v49 }
 0x225   : > { %949 = vmatprep.subr.bf16.mxu1 %v896_v11  ;;  %1330 = vpow2.f32 %v777_v59  ;;  %v698_v52 = vsub.f32 %v1669_v47, %v606_v5  ;;  %v765_v2 = vmul.f32 1.442695, %v696_v57  ;;  %v597_v47 = vpop.xlane.xlu0 %596  ;;  %v697_v58 = vsub.f32 %v1667_v46, %v606_v5  ;;  %v2038_v59 = vld [vmem:[#allocation8_spill] sm:$0xff]  ;;  %v2040_v57 = vld [vmem:[#allocation19_spill] sm:$0xff] }
 0x226   : > { %v1307_v23 = vpop.eup %1306  ;;  %1332 = vpow2.f32 %v779_v60  ;;  %v692_v24 = vsub.f32 %v2037_v0, %v597_v47 }
 0x227   : > { %v1309_v61 = vpop.eup %1308  ;;  %1334 = vpow2.f32 %v773_v4  ;;  %v769_v12 = vmul.f32 1.442695, %v698_v52 }
 0x228   : > { %v1311_v55 = vpop.eup %1310  ;;  %v895_v56 = vpack.c.bf16 %v1305_v34, %v1309_v61  ;;  %v600_v34 = vpop.xlane.xlu1 %599  ;;  %1336 = vpow2.f32 %v775_v8  ;;  %v757_v46 = vmul.f32 1.442695, %v692_v24 }
 0x229   : > { %v894_v53 = vpack.c.bf16 %v1307_v23, %v1311_v55  ;;  %v1313_v42 = vpop.eup %1312  ;;  %1338 = vpow2.f32 %v769_v12  ;;  %v694_v61 = vsub.f32 %v2035_v48, %v600_v34  ;;  %v695_v55 = vsub.f32 %v2036_v45, %v603_v51 }
 0x22a   : > { %v1315_v44 = vpop.eup %1314  ;;  %1340 = vpow2.f32 %v771_v3 }
 0x22b   : > { %950 = vmatpush1.bf16.xpose.msra.mxu1 %v895_v56  ;;  %v1317_v54 = vpop.eup %1316  ;;  %1342 = vpow2.f32 %v765_v2  ;;  %v767_v56 = vmul.f32 1.442695, %v697_v58  ;;  %v763_v62 = vmul.f32 1.442695, %v695_v55 }
 0x22c   : > { %951 = vmatprep.subr.bf16.mxu1 %v894_v53  ;;  %v1319_v43 = vpop.eup %1318  ;;  %v893_v20 = vpack.c.bf16 %v1313_v42, %v1317_v54  ;;  %v761_v53 = vmul.f32 1.442695, %v694_v61  ;;  %v2039_v54 = vld [vmem:[#allocation6_spill] sm:$0xff] }
 0x22d   : > { %v892_v19 = vpack.c.bf16 %v1315_v44, %v1319_v43  ;;  %v1321_v1 = vpop.eup %1320  ;;  %1344 = vpow2.f32 %v767_v56  ;;  %v693_v44 = vsub.f32 %v2038_v59, %v600_v34  ;;  %v691_v4 = vsub.f32 %v2039_v54, %v597_v47 }
 0x22e   : > { %v1323_v11 = vpop.eup %1322  ;;  %1346 = vpow2.f32 %v761_v53 }
 0x22f   : > { %v1325_v50 = vpop.eup %1324  ;;  %1348 = vpow2.f32 %v763_v62  ;;  %v759_v43 = vmul.f32 1.442695, %v693_v44  ;;  %v755_v52 = vmul.f32 1.442695, %v691_v4 }
 0x230   : > { %v1327_v23 = vpop.eup %1326  ;;  %v891_v31 = vpack.c.bf16 %v1321_v1, %v1325_v50  ;;  %1350 = vpow2.f32 %v757_v46 }
 0x231   : > { %v890_v63 = vpack.c.bf16 %v1323_v11, %v1327_v23  ;;  %v1329_v33 = vpop.eup %1328  ;;  %1352 = vpow2.f32 %v759_v43 }
 0x232   : > { %v1331_v27 = vpop.eup %1330  ;;  %1354 = vpow2.f32 %v755_v52 }
 0x233   : > { %952 = vmatpush1.bf16.xpose.msra.mxu1 %v893_v20  ;;  %v1333_v41 = vpop.eup %1332 }
 0x234   : > { %953 = vmatprep.subr.bf16.mxu1 %v892_v19  ;;  %v1335_v42 = vpop.eup %1334  ;;  %v889_v60 = vpack.c.bf16 %v1329_v33, %v1333_v41 }
 0x235   : > { %v888_v5 = vpack.c.bf16 %v1331_v27, %v1335_v42  ;;  %v1337_v51 = vpop.eup %1336 }
 0x236   : > { %v1339_v20 = vpop.eup %1338 }
 0x237   : > { %v1341_v49 = vpop.eup %1340 }
 0x238   : > { %v1343_v1 = vpop.eup %1342  ;;  %v887_v12 = vpack.c.bf16 %v1337_v51, %v1341_v49 }
 0x239   : > { %v886_v11 = vpack.c.bf16 %v1339_v20, %v1343_v1 }
 0x23b   : > { %954 = vmatpush1.bf16.xpose.msra.mxu1 %v891_v31  ;;  %v1345_v31 = vpop.eup %1344 }
 0x23c   : > { %955 = vmatprep.subr.bf16.mxu1 %v890_v63  ;;  %v1347_v63 = vpop.eup %1346 }
 0x23d   : > { %v1349_v45 = vpop.eup %1348 }
 0x23e   : > { %v1351_v0 = vpop.eup %1350  ;;  %v885_v33 = vpack.c.bf16 %v1345_v31, %v1349_v45 }
 0x23f   : > { %v1353_v46 = vpop.eup %1352 }
 0x240   : > { %v1355_v44 = vpop.eup %1354 }
 0x243   : > { %956 = vmatpush1.bf16.xpose.msra.mxu1 %v889_v60 }
 0x244   : > { %957 = vmatprep.subr.bf16.mxu1 %v888_v5 }
 0x248   : > { %v687_v7 = vpop.xlane.xlu0 %686 }
 0x249   : > { %v751_v19 = vsub.f32 %v1807_v30, %v687_v7  ;;  %v752_v8 = vsub.f32 %v2040_v57, %v687_v7 }
 0x24b   : > { %v875_v50 = vmul.f32 1.442695, %v751_v19  ;;  %958 = vmatpush1.bf16.xpose.msra.mxu1 %v887_v12  ;;  %v877_v23 = vmul.f32 1.442695, %v752_v8 }
 0x24c   : > { %v681_v3 = vpop.xlane.xlu0 %680  ;;  %v690_v34 = vpop.xlane.xlu1 %689  ;;  %959 = vmatprep.subr.bf16.mxu1 %v886_v11 }
 0x24d   : > { %v753_v2 = vsub.f32 %v1813_v37, %v690_v34  ;;  %v754_v47 = vsub.f32 %v1815_v40, %v690_v34  ;;  %v748_v30 = vsub.f32 %v1801_v25, %v681_v3  ;;  %1356 = vpow2.f32 %v875_v50 }
 0x24e   : > { %1358 = vpow2.f32 %v877_v23  ;;  %v884_v25 = vpack.c.bf16 %v1347_v63, %v1351_v0  ;;  %v747_v27 = vsub.f32 %v1799_v22, %v681_v3  ;;  %v883_v22 = vpack.c.bf16 %v1353_v46, %v1355_v44 }
 0x24f   : > { %v879_v58 = vmul.f32 1.442695, %v753_v2  ;;  %v881_v48 = vmul.f32 1.442695, %v754_v47  ;;  %v869_v24 = vmul.f32 1.442695, %v748_v30 }
 0x250   : > { %v684_v61 = vpop.xlane.xlu1 %683  ;;  %v675_v37 = vpop.xlane.xlu0 %674  ;;  %v867_v59 = vmul.f32 1.442695, %v747_v27 }
 0x251   : > { %v750_v55 = vsub.f32 %v1805_v29, %v684_v61  ;;  %1360 = vpow2.f32 %v879_v58  ;;  %v749_v56 = vsub.f32 %v1803_v26, %v684_v61  ;;  %v744_v62 = vsub.f32 %v1793_v17, %v675_v37 }
 0x252   : > { %1362 = vpow2.f32 %v881_v48 }
 0x253   : > { %v873_v40 = vmul.f32 1.442695, %v750_v55  ;;  %960 = vmatpush1.bf16.xpose.msra.mxu1 %v885_v33  ;;  %1364 = vpow2.f32 %v869_v24  ;;  %v871_v29 = vmul.f32 1.442695, %v749_v56  ;;  %v861_v60 = vmul.f32 1.442695, %v744_v62 }
 0x254   : > { %v678_v53 = vpop.xlane.xlu1 %677  ;;  %961 = vmatprep.subr.bf16.mxu1 %v884_v25  ;;  %v669_v5 = vpop.xlane.xlu0 %668  ;;  %v2041_v62 = vld [vmem:[#allocation18_spill] sm:$0xff] }
 0x255   : > { %v746_v41 = vsub.f32 %v1797_v21, %v678_v53  ;;  %1366 = vpow2.f32 %v873_v40  ;;  %v745_v54 = vsub.f32 %v1795_v18, %v678_v53  ;;  %v743_v21 = vsub.f32 %v1791_v14, %v675_v37 }
 0x256   : > { %1368 = vpow2.f32 %v871_v29  ;;  %v740_v43 = vsub.f32 %v1785_v9, %v669_v5  ;;  %v739_v3 = vsub.f32 %v1783_v6, %v669_v5 }
 0x257   : > { %v865_v42 = vmul.f32 1.442695, %v746_v41  ;;  %v863_v7 = vmul.f32 1.442695, %v745_v54  ;;  %v859_v49 = vmul.f32 1.442695, %v743_v21 }
 0x258   : > { %v672_v26 = vpop.xlane.xlu1 %671  ;;  %v853_v18 = vmul.f32 1.442695, %v740_v43 }
 0x259   : > { %1370 = vpow2.f32 %v865_v42  ;;  %v742_v17 = vsub.f32 %v1789_v13, %v672_v26  ;;  %v663_v13 = vpop.xlane.xlu0 %662  ;;  %v741_v12 = vsub.f32 %v1787_v10, %v672_v26  ;;  %v851_v10 = vmul.f32 1.442695, %v739_v3  ;;  %v2044_v26 = vld [vmem:[#allocation14_spill] sm:$0xff] }
 0x25a   : > { %1372 = vpow2.f32 %v867_v59  ;;  %v1357_v4 = vpop.eup %1356  ;;  %v736_v34 = vsub.f32 %v1775_v36, %v663_v13  ;;  %v735_v55 = vsub.f32 %v1773_v35, %v663_v13  ;;  %v2042_v35 = vld [vmem:[#allocation16_spill] sm:$0xff] }
 0x25b   : > { %962 = vmatpush1.bf16.xpose.msra.mxu1 %v883_v22  ;;  %1374 = vpow2.f32 %v861_v60  ;;  %v1359_v51 = vpop.eup %1358  ;;  %v857_v52 = vmul.f32 1.442695, %v742_v17  ;;  %v855_v2 = vmul.f32 1.442695, %v741_v12 }
 0x25c   : > { %v666_v57 = vpop.xlane.xlu1 %665  ;;  %1376 = vpow2.f32 %v863_v7  ;;  %v845_v48 = vmul.f32 1.442695, %v736_v34  ;;  %v843_v40 = vmul.f32 1.442695, %v735_v55 }
 0x25d   : > { %1378 = vpow2.f32 %v857_v52  ;;  %v738_v11 = vsub.f32 %v1781_v39, %v666_v57  ;;  %v657_v61 = vpop.xlane.xlu0 %656  ;;  %v737_v63 = vsub.f32 %v1779_v38, %v666_v57 }
 0x25e   : > { %v1361_v20 = vpop.eup %1360  ;;  %1380 = vpow2.f32 %v859_v49  ;;  %v732_v0 = vsub.f32 %v1759_v28, %v657_v61  ;;  %v2043_v28 = vld [vmem:[#allocation17_spill] sm:$0xff] }
 0x25f   : > { %v1363_v19 = vpop.eup %1362  ;;  %v913_v1 = vpack.c.bf16 %v1361_v20, %v1357_v4  ;;  %1382 = vpow2.f32 %v853_v18  ;;  %v849_v47 = vmul.f32 1.442695, %v738_v11  ;;  %v847_v24 = vmul.f32 1.442695, %v737_v63  ;;  %v2045_v20 = vld [vmem:[#allocation15_spill] sm:$0xff]  ;;  %v2046_v18 = vld [vmem:[#allocation13_spill] sm:$0xff] }
 0x260   : > { %v914_v8 = vpack.c.bf16 %v1363_v19, %v1359_v51  ;;  %v1365_v14 = vpop.eup %1364  ;;  %v660_v58 = vpop.xlane.xlu1 %659  ;;  %1384 = vpow2.f32 %v855_v2  ;;  %v837_v53 = vmul.f32 1.442695, %v732_v0  ;;  %v731_v59 = vsub.f32 %v2043_v28, %v657_v61 }
 0x261   : > { %1386 = vpow2.f32 %v849_v47  ;;  %v734_v45 = vsub.f32 %v1767_v32, %v660_v58  ;;  %v651_v32 = vpop.xlane.xlu0 %650  ;;  %v733_v41 = vsub.f32 %v2041_v62, %v660_v58 }
 0x262   : > { %963 = vmatprep.subr.bf16.mxu1 %v914_v8  ;;  %v1367_v9 = vpop.eup %1366  ;;  %1388 = vpow2.f32 %v851_v10  ;;  %v728_v44 = vsub.f32 %v2044_v26, %v651_v32  ;;  %v835_v17 = vmul.f32 1.442695, %v731_v59  ;;  %v727_v8 = vsub.f32 %v2046_v18, %v651_v32 }
 0x263   : > { %964 = vmatpush2.bf16.xpose.msra.mxu1 %v913_v1  ;;  %v912_v50 = vpack.c.bf16 %v1367_v9, %v1365_v14  ;;  %v1369_v23 = vpop.eup %1368  ;;  %1390 = vpow2.f32 %v845_v48  ;;  %v841_v56 = vmul.f32 1.442695, %v734_v45  ;;  %v839_v60 = vmul.f32 1.442695, %v733_v41  ;;  %v2047_v1 = vld [vmem:[#allocation12_spill] sm:$0xff] }
 0x264   : > { %v654_v25 = vpop.xlane.xlu1 %653  ;;  %1392 = vpow2.f32 %v847_v24  ;;  %v829_v43 = vmul.f32 1.442695, %v728_v44  ;;  %v827_v3 = vmul.f32 1.442695, %v727_v8 }
 0x265   : > { %965 = vmatprep.subr.bf16.mxu1 %v912_v50  ;;  %1394 = vpow2.f32 %v841_v56  ;;  %v730_v46 = vsub.f32 %v2042_v35, %v654_v25  ;;  %v645_v7 = vpop.xlane.xlu0 %644  ;;  %v729_v52 = vsub.f32 %v2045_v20, %v654_v25  ;;  %v1284_v25 = vld [vmem:[%s1865_s15] ss:$8 sps:$4 sm:$0xff]  }
 0x266   : > { %v1371_v30 = vpop.eup %1370  ;;  %1396 = vpow2.f32 %v843_v40  ;;  %v724_v13 = vsub.f32 %v2047_v1, %v645_v7 }
 0x267   : > { %v1373_v31 = vpop.eup %1372  ;;  %1398 = vpow2.f32 %v837_v53  ;;  %v833_v54 = vmul.f32 1.442695, %v730_v46  ;;  %v831_v12 = vmul.f32 1.442695, %v729_v52  ;;  %v919_v53 = vld [vmem:[%s1865_s15 + $0x20] sm:$0x11] }
 0x268   : > { %v1375_v39 = vpop.eup %1374  ;;  %v911_v6 = vpack.c.bf16 %v1369_v23, %v1373_v31  ;;  %v648_v21 = vpop.xlane.xlu1 %647  ;;  %1400 = vpow2.f32 %v839_v60  ;;  %v821_v50 = vmul.f32 1.442695, %v724_v13  ;;  %v1208_v32 = vcombine.high %v919_v53, %v919_v53 }
 0x269   : > { %v910_v36 = vpack.c.bf16 %v1371_v30, %v1375_v39  ;;  %v1377_v37 = vpop.eup %1376  ;;  %1402 = vpow2.f32 %v833_v54  ;;  %v726_v49 = vsub.f32 %v1735_v16, %v648_v21  ;;  %v725_v16 = vsub.f32 %v1733_v15, %v648_v21  ;;  %v2048_v30 = vld [vmem:[#allocation11_spill] sm:$0xff] }
 0x26a   : > { %v1379_v33 = vpop.eup %1378  ;;  %1404 = vpow2.f32 %v835_v17  ;;  %v723_v10 = vsub.f32 %v2048_v30, %v645_v7  ;;  %v1207_v62 = vcombine.low %v919_v53, %v919_v53  ;;  %v1027_v7 = vstv %s1010_s16 }
 0x26b   : > { %966 = vmatpush2.bf16.xpose.msra.mxu1 %v911_v6  ;;  %v1381_v38 = vpop.eup %1380  ;;  %1406 = vpow2.f32 %v829_v43  ;;  %v825_v11 = vmul.f32 1.442695, %v726_v49  ;;  %v823_v58 = vmul.f32 1.442695, %v725_v16  ;;  %v1426_v16 = vld [vmem:[%s1608_s9 + $0x20] sm:$0xff] }
 0x26c   : > { %967 = vmatprep.subr.bf16.mxu1 %v910_v36  ;;  %v1383_v27 = vpop.eup %1382  ;;  %v909_v29 = vpack.c.bf16 %v1377_v37, %v1381_v38  ;;  %1408 = vpow2.f32 %v831_v12  ;;  %v819_v39 = vmul.f32 1.442695, %v723_v10  ;;  %v1287_v38 = vld [vmem:[%s1865_s15 + $0x14] ss:$8 sps:$4 sm:$0xff]  }
 0x26d   : > { %v908_v42 = vpack.c.bf16 %v1379_v33, %v1383_v27  ;;  %v1385_v5 = vpop.eup %1384  ;;  %1410 = vpow2.f32 %v825_v11  ;;  %v1289_v27 = vld [vmem:[%s1865_s15 + $0x10] ss:$8 sps:$4 sm:$0xff]  }
 0x26e   : > { %v1387_v22 = vpop.eup %1386  ;;  %1412 = vpow2.f32 %v827_v3  ;;  %v1424_v3 = vld [vmem:[%s1608_s9] sm:$0xff] }
 0x26f   : > { %v1389_v4 = vpop.eup %1388  ;;  %1414 = vpow2.f32 %v821_v50  ;;  %v1425_v50 = vld [vmem:[%s1608_s9 + $0x10] sm:$0xff] }
 0x270   : > { %v1391_v51 = vpop.eup %1390  ;;  %v907_v19 = vpack.c.bf16 %v1385_v5, %v1389_v4  ;;  %1416 = vpow2.f32 %v823_v58  ;;  %v1011_v5 = vlaneseq }
 0x271   : > { %v906_v57 = vpack.c.bf16 %v1387_v22, %v1391_v51  ;;  %v1393_v14 = vpop.eup %1392  ;;  %1418 = vpow2.f32 %v819_v39  ;;  %v1428_v39 = vld [vmem:[%s1608_s9 + $0x8] sm:$0xff] }
 0x272   : > { %v1395_v9 = vpop.eup %1394  ;;  %v1012_v17 = vshrl.u32 %v1011_v5, 7 }
 0x273   : > { %968 = vmatpush2.bf16.xpose.msra.mxu1 %v909_v29  ;;  %v1397_v34 = vpop.eup %1396 }
 0x274   : > { %969 = vmatprep.subr.bf16.mxu1 %v908_v42  ;;  %v1399_v2 = vpop.eup %1398  ;;  %v905_v23 = vpack.c.bf16 %v1393_v14, %v1397_v34  ;;  %v1013_v21 = vsub.s32 0, %v1012_v17 }
 0x275   : > { %v904_v47 = vpack.c.bf16 %v1395_v9, %v1399_v2  ;;  %v1401_v31 = vpop.eup %1400 }
 0x276   : > { %v1403_v48 = vpop.eup %1402 }
 0x277   : > { %v1405_v61 = vpop.eup %1404 }
 0x278   : > { %v1407_v63 = vpop.eup %1406  ;;  %v903_v6 = vpack.c.bf16 %v1401_v31, %v1405_v61 }
 0x279   : > { %v902_v45 = vpack.c.bf16 %v1403_v48, %v1407_v63  ;;  %v1409_v15 = vpop.eup %1408  ;;  %v1429_v63 = vld [vmem:[%s1608_s9 + $0x18] sm:$0xff] }
 0x27a   : > { %v1411_v36 = vpop.eup %1410 }
 0x27b   : > { %970 = vmatpush2.bf16.xpose.msra.mxu1 %v907_v19  ;;  %v1413_v55 = vpop.eup %1412 }
 0x27c   : > { %971 = vmatprep.subr.bf16.mxu1 %v906_v57  ;;  %v1415_v0 = vpop.eup %1414  ;;  %v901_v24 = vpack.c.bf16 %v1409_v15, %v1413_v55 }
 0x27d   : > { %v900_v37 = vpack.c.bf16 %v1411_v36, %v1415_v0  ;;  %v1417_v56 = vpop.eup %1416  ;;  %v1431_v36 = vld [vmem:[%s1608_s9 + $0x38] sm:$0xff] }
 0x27e   : > { %v1419_v33 = vpop.eup %1418 }
 0x27f   : > { %v899_v40 = vpack.c.bf16 %v1417_v56, %v1419_v33 }
 0x283   : > { %972 = vmatpush2.bf16.xpose.msra.mxu1 %v905_v23 }
 0x284   : > { %973 = vmatprep.subr.bf16.mxu1 %v904_v47  ;;  %v1427_v47 = vld [vmem:[%s1608_s9 + $0x30] sm:$0xff] }
 0x28b   : > { %974 = vmatpush2.bf16.xpose.msra.mxu1 %v903_v6 }
 0x28c   : > { %975 = vmatprep.subr.bf16.mxu1 %v902_v45  ;;  %v1430_v45 = vld [vmem:[%s1608_s9 + $0x28] sm:$0xff] }
 0x293   : > { %976 = vmatpush2.bf16.xpose.msra.mxu1 %v901_v24 }
 0x294   : > { %977 = vmatprep.subr.bf16.mxu1 %v900_v37 }
 0x29b   : > { %978 = vmatpush2.bf16.xpose.msra.mxu1 %v899_v40 }
 0x2a2   : > { %980 = vmatmul.mubr.bf16.vlgmr.msra.gmra.mxu1 %v1284_v25 }
 0x2a3   : > { %989 = vmatprep.mubr.bf16.mxu1 %v1287_v38 }
 0x2aa   : > { %990 = vmatmul.mubr.bf16.gmra.mxu1 %v1289_v27 }
 0x2ab   : > { %999 = vmatprep.mubr.bf16.mxu1 %v1208_v32 }
 0x2b2   : > { %1000 = vmatmul.mubr.bf16.gmra.mxu1 %v1207_v62 }
 0x362   : > { %v981_v41 = vpop.f32.mrf.mxu1 }
 0x364   : > { %v983_v29 = vpop.f32.mrf.mxu1 }
 0x366   : > { %v985_v35 = vpop.f32.mrf.mxu1 }
 0x368   : > { %v987_v46 = vpop.f32.mrf.mxu1 }
 0x36a   : > { %v991_v42 = vpop.f32.mrf.mxu1 }
 0x36c   : > { %v993_v28 = vpop.f32.mrf.mxu1 }
 0x36e   : > { %v995_v59 = vpop.f32.mrf.mxu1 }
 0x370   : > { %v997_v26 = vpop.f32.mrf.mxu1 }
 0x372   : > { %v1001_v44 = vpop.f32.mrf.mxu1 }
 0x373   : > { %1420 = vrcp.f32 %v1001_v44 }
 0x374   : > { %v1003_v60 = vpop.f32.mrf.mxu1 }
 0x375   : > { %1422 = vrcp.f32 %v1003_v60 }
 0x376   : > { %v1005_v54 = vpop.f32.mrf.mxu1 }
 0x378   : > { %v1006_v22 = vpop.f32.mrf.mxu1 }
 0x380   : > { %v1421_v4 = vpop.eup %1420 }
 0x381   : > { %v1014_v43 = vrot.slane %v1421_v4, %v1013_v21 }
 0x382   : > { %v1423_v51 = vpop.eup %1422 }
 0x383   : > { %v1019_v20 = vmul.f32 %v1014_v43, %v981_v41  ;;  %v1021_v52 = vmul.f32 %v1014_v43, %v985_v35  ;;  %v1023_v19 = vmul.f32 %v1014_v43, %v991_v42  ;;  %v1025_v49 = vmul.f32 %v1014_v43, %v995_v59 }
 0x384   : > { %v1018_v57 = vrot.slane %v1423_v51, %v1013_v21 }
 0x385   : > { %v1028_v18 = vmul.f32 %v1027_v7, %v1019_v20  ;;  %v1030_v8 = vmul.f32 %v1027_v7, %v1021_v52  ;;  %v1032_v1 = vmul.f32 %v1027_v7, %v1023_v19  ;;  %v1034_v13 = vmul.f32 %v1027_v7, %v1025_v49 }
 0x386   : > { %v1020_v12 = vmul.f32 %v1018_v57, %v983_v29  ;;  %v1022_v14 = vmul.f32 %v1018_v57, %v987_v46  ;;  %v1024_v11 = vmul.f32 %v1018_v57, %v993_v28  ;;  %v1026_v9 = vmul.f32 %v1018_v57, %v997_v26 }
 0x387   : > { %v1036_v34 = vadd.f32 %v1424_v3, %v1028_v18  ;;  %v1038_v2 = vadd.f32 %v1425_v50, %v1030_v8  ;;  %v1040_v23 = vadd.f32 %v1426_v16, %v1032_v1  ;;  %v1042_v30 = vadd.f32 %v1427_v47, %v1034_v13 }
 0x388   : > { %v1029_v10 = vmul.f32 %v1027_v7, %v1020_v12  ;;  %v1031_v58 = vmul.f32 %v1027_v7, %v1022_v14  ;;  %v1033_v31 = vmul.f32 %v1027_v7, %v1024_v11  ;;  %v1035_v48 = vmul.f32 %v1027_v7, %v1026_v9 }
 0x389   : > { %1044 = vst [vmem:[%s1927_s27] sm:$0xff] %v1036_v34  ;;  %1046 = vst [vmem:[%s1927_s27 + $0x10] sm:$0xff] %v1038_v2 }
 0x38a   : > { %1048 = vst [vmem:[%s1927_s27 + $0x20] sm:$0xff] %v1040_v23  ;;  %1050 = vst [vmem:[%s1927_s27 + $0x30] sm:$0xff] %v1042_v30  ;;  %v1037_v61 = vadd.f32 %v1428_v39, %v1029_v10  ;;  %v1039_v6 = vadd.f32 %v1429_v63, %v1031_v58  ;;  %v1041_v15 = vadd.f32 %v1430_v45, %v1033_v31 }
 0x38b   : > { %v1043_v55 = vadd.f32 %v1431_v36, %v1035_v48 }
 0x38c   : > { %1045 = vst [vmem:[%s1927_s27 + $0x8] sm:$0xff] %v1037_v61  ;;  %1047 = vst [vmem:[%s1927_s27 + $0x18] sm:$0xff] %v1039_v6 }
 0x38d   : > { %1049 = vst [vmem:[%s1927_s27 + $0x28] sm:$0xff] %v1041_v15  ;;  %1051 = vst [vmem:[%s1927_s27 + $0x38] sm:$0xff] %v1043_v55 }
 0x38e   : > { %1445 = shalt.err (!%p1442_p5)
}
 0x38f   : > { %s1446_s9 = scalar_lea.hbm %s1941_s6, 1024  ;;  %s1450_s15 = scalar_lea.hbm %s2004_s4, 2048 }
 0x390   : > { %p1447_p6 = scmp.ne.s32.totalorder %s1941_s6, %s1446_s9  ;;  %p1451_p10 = scmp.lt.s32.totalorder %s1941_s6, %s2004_s4 }
 0x391   : > { %p1452_p11 = scmp.lt.s32.totalorder %s1450_s15, %s1446_s9 }
 0x392   : > { %p1448_p7 = pnand %p1447_p6, %p1583_p4 }
 0x393   : > { %p1453_p12 = por %p1452_p11, %p1451_p10 }
 0x394   : > { %p1449_p9 = pneg %p1448_p7 }
 0x396   : > { %p1454_p13 = pnand %p1453_p12, %p1449_p9 }
 0x398   : > { %1457 = shalt.err (!%p1454_p13)
}
 0x399   : > { %s1513_s23 = smov 256   ;;  %s1514_s25 = smov 16  }
 0x39a   : > { %1217 = dma.vmem_to_hbm [thread:$0]  (%p1583_p4), %s1943_s30, 1024, %s1941_s6, %s1955_s7, %s1513_s23, %s1513_s23, %s1514_s25  }
 0x39b PF: > { %p1223_p0 = scmp.ge.s32.totalorder %s1508_s22, 2  ;;  %s1083_s27 = sand.u32 1, %s1488_s17  }
 0x39c   : > { %s1084_s20 = scalar_lea.sflag [#allocation4], %s1083_s27 }
 0x39d   : > { %p1220_p1 = pnand %p1223_p0, %p1590_p8 }
 0x39f   : > { %p1221_p2 = pneg %p1220_p1 }
 0x3a1   : > { %1483 = dma.done.wait (%p1221_p2), %s1084_s20, 1024  }
 0x3a2   : > { %1485 = vsyncadd (%p1221_p2), %s1084_s20, 4294966272  ;;  %s18_s22 = sadd.s32 1, %s1508_s22   ;;  %s2049_s17 = smov %s1492_s18 }
 0x3a3   : > { %p15_p3 = scmp.ge.s32.totalorder %s18_s22, 4   ;;  %s2050_s18 = smov %s1496_s19 }
 0x3a4   : > { %s2051_s19 = smov %s1596_s29  ;;  %s2052_s20 = smov %s1504_s21 }
 0x3a5   : > { %s2053_s21 = smov %s2055_s24  ;;  %17 = sbr.rel (!%p15_p3) target bundleno = 6 (0x6), region = 77 }
 0x3aa   :  { %1089 = vsyncpa [#allocation4], 1 }
 0x3ab   :  { %1091 = vsyncpa [#allocation4 + $0x1], 1 }

</bundles_post_ra>
